<compile_context>
chip_gen: v7x
topology: tpu7x:2x2x1
jax: 0.10.0
libtpu: 0.0.40
codegen_flags: <defaults>
</compile_context>

<pallas_src>
import jax
import jax.numpy as jnp
from jax.experimental import pallas as pl
from jax.experimental.pallas import tpu as pltpu


def _round_up(v, m):
    return ((v + m - 1) // m) * m


def chanle_block_kernel(x_ref, wab_ref, w2m_ref, o_ref):
    # x_ref:   (1, Cin, HW)       current sample, channels on sublanes, HW on lanes
    # wab_ref: (2*Cin_pad, Cin)   [conva; 0-pad; convb; 0-pad] stacked along rows,
    #                             each half starting at a sublane-aligned offset
    # w2m_ref: (Cout, Cin)        conv2 weight with the +/-1 mask pre-folded in
    # o_ref:   (1, Cout, HW)
    x = x_ref[0].astype(jnp.float32)                     # (Cin, HW)
    cin = x.shape[0]
    hw = x.shape[1]
    cin_pad = wab_ref.shape[0] // 2                      # sublane-aligned half size

    # Both 1x1 "gate" convs in a single MXU pass: (2*Cin_pad, Cin) @ (Cin, HW).
    ab = jnp.dot(wab_ref[...].astype(jnp.float32), x,
                 preferred_element_type=jnp.float32)     # (2*Cin_pad, HW)
    a = ab[:cin]                                         # (Cin, HW)  tile-aligned slice
    b = ab[cin_pad:cin_pad + cin]                        # (Cin, HW)  tile-aligned slice

    t = a * x + b                                        # gated combine (VPU)

    # conv2 (mask already folded into the weight): (Cout, Cin) @ (Cin, HW).
    z = jnp.dot(w2m_ref[...].astype(jnp.float32), t,
                preferred_element_type=jnp.float32)      # (Cout, HW)

    # InstanceNorm2d (affine=False, eps=1e-5): per-channel stats over HW in a
    # single pass: mean = s/HW, var = ss/HW - mean^2 (biased, f32 accumulation).
    inv_hw = 1.0 / hw
    s = jnp.sum(z, axis=-1, keepdims=True)               # (Cout, 1)  XLU reduce
    ss = jnp.sum(z * z, axis=-1, keepdims=True)          # (Cout, 1)  XLU reduce
    mean = s * inv_hw
    var = ss * inv_hw - mean * mean
    y = (z - mean) * jax.lax.rsqrt(var + 1e-5)           # rsqrt -> EUP slot

    o_ref[0] = jnp.maximum(y, 0.0).astype(o_ref.dtype)   # ReLU


def chanle_block(x_nchw, wa, wb, w2, mask):
    """x_nchw: (N, Cin, H, W); wa, wb: (Cin, Cin); w2: (Cout, Cin); mask: (Cout,)."""
    N, Cin, H, W = x_nchw.shape
    Cout = w2.shape[0]
    HW = H * W

    # NCHW -> (N, Cin, HW): pure reshape, no HBM transpose pass.
    x_ncp = x_nchw.reshape(N, Cin, HW)

    # Stack gate weights at sublane-aligned (multiple-of-8) row offsets so the
    # kernel-side slices of the stacked matmul result are tile-aligned.
    cin_pad = _round_up(Cin, 8)
    wab = jnp.zeros((2 * cin_pad, Cin), dtype=wa.dtype)
    wab = wab.at[:Cin].set(wa)
    wab = wab.at[cin_pad:cin_pad + Cin].set(wb)

    # Fold the +/-1 channel mask into conv2's weight.
    w2m = w2 * mask[:, None]                              # (Cout, Cin)

    out_ncp = pl.pallas_call(
        chanle_block_kernel,
        out_shape=jax.ShapeDtypeStruct((N, Cout, HW), x_nchw.dtype),
        grid_spec=pltpu.PrefetchScalarGridSpec(
            num_scalar_prefetch=0,
            grid=(N,),
            in_specs=[
                pl.BlockSpec((1, Cin, HW), lambda n: (n, 0, 0)),
                pl.BlockSpec((2 * cin_pad, Cin), lambda n: (0, 0)),
                pl.BlockSpec((Cout, Cin), lambda n: (0, 0)),
            ],
            out_specs=pl.BlockSpec((1, Cout, HW), lambda n: (n, 0, 0)),
        ),
        compiler_params=pltpu.CompilerParams(
            dimension_semantics=("parallel",),
        ),
    )(x_ncp, wab, w2m)

    # (N, Cout, HW) -> NCHW: free reshape.
    return out_ncp.reshape(N, Cout, H, W)
    # TODO(synk): if H*W grows large, tile the HW axis and switch InstanceNorm
    # to two-stage (per-tile partial sums in scratch) so slabs fit v7x VMEM.


def _reference(x_nchw, wa, wb, w2, mask):
    """Pure-JAX reference of the PyTorch forward (for verification)."""
    a = jnp.einsum("oc,nchw->nohw", wa, x_nchw)
    b = jnp.einsum("oc,nchw->nohw", wb, x_nchw)
    t = a * x_nchw + b
    z = jnp.einsum("oc,nchw->nohw", w2, t)
    m = z * mask[None, :, None, None]
    mean = jnp.mean(m, axis=(2, 3), keepdims=True)
    var = jnp.mean((m - mean) ** 2, axis=(2, 3), keepdims=True)
    y = (m - mean) * jax.lax.rsqrt(var + 1e-5)
    return jnp.maximum(y, 0.0)


if __name__ == "__main__":
    key = jax.random.PRNGKey(0)
    k_x, k_a, k_b, k_2 = jax.random.split(key, 4)

    N, C_IN, C_OUT, H, W = 2, 4, 8, 16, 16

    x = jax.random.normal(k_x, (N, C_IN, H, W), dtype=jnp.float32)

    # Conv2d 1x1 weights, bias=False (deterministic init).
    wa = jax.random.normal(k_a, (C_IN, C_IN), dtype=jnp.float32) * 0.5
    wb = jax.random.normal(k_b, (C_IN, C_IN), dtype=jnp.float32) * 0.5
    w2 = jax.random.normal(k_2, (C_OUT, C_IN), dtype=jnp.float32) * 0.5

    # Mask_1Chanle: ones, with even channel indices set to -1.
    mask = jnp.where(jnp.arange(C_OUT) % 2 == 0, -1.0, 1.0).astype(jnp.float32)

    y = chanle_block(x, wa, wb, w2, mask)
    jax.block_until_ready(y)

    y_ref = _reference(x, wa, wb, w2, mask)
    assert jnp.allclose(y, y_ref, atol=1e-4, rtol=1e-4), "mismatch vs reference"

    print("KERNEL_OK")
</pallas_src>

<mosaic_0001>
module attributes {stable_mosaic.version = 11 : i64} {
  func.func @chanle_block_kernel(%arg0: i32, %arg1: memref<1x4x256xf32, #tpu.memory_space<vmem>>, %arg2: memref<16x4xf32, #tpu.memory_space<vmem>>, %arg3: memref<8x4xf32, #tpu.memory_space<vmem>>, %arg4: memref<1x8x256xf32, #tpu.memory_space<vmem>>) attributes {dimension_semantics = [#tpu.dimension_semantics<parallel>], iteration_bounds = array<i64: 2>, scalar_prefetch = 0 : i64, scratch_operands = 0 : i64, tpu.core_type = #tpu.core_type<tc>, window_params = [{transform_indices = @transform_0, window_bounds = array<i64: 1, 4, 256>}, {pipeline_mode = #tpu.pipeline_mode<synchronous>, transform_indices = @transform_1, window_bounds = array<i64: 16, 4>}, {pipeline_mode = #tpu.pipeline_mode<synchronous>, transform_indices = @transform_2, window_bounds = array<i64: 8, 4>}, {transform_indices = @transform_3, window_bounds = array<i64: 1, 8, 256>}]} {
    %c0 = arith.constant 0 : index
    %c0_0 = arith.constant 0 : index
    %c0_1 = arith.constant 0 : index
    %0 = vector.load %arg1[%c0, %c0_0, %c0_1] : memref<1x4x256xf32, #tpu.memory_space<vmem>>, vector<1x4x256xf32>
    %1 = vector.shape_cast %0 : vector<1x4x256xf32> to vector<4x256xf32>
    %c0_2 = arith.constant 0 : index
    %c0_3 = arith.constant 0 : index
    %2 = vector.load %arg2[%c0_2, %c0_3] : memref<16x4xf32, #tpu.memory_space<vmem>>, vector<16x4xf32>
    %cst = arith.constant dense<0.000000e+00> : vector<16x256xf32>
    %3 = tpu.matmul %2, %1, %cst {dimension_numbers = #tpu.dot_dimension_numbers<[1], [0], [0], [1], [0, 0, 1, 1], [], []>} : vector<16x4xf32>, vector<4x256xf32>, vector<16x256xf32> -> vector<16x256xf32>
    %4 = vector.extract_strided_slice %3 {offsets = [0, 0], sizes = [4, 256], strides = [1, 1]} : vector<16x256xf32> to vector<4x256xf32>
    %5 = vector.extract_strided_slice %3 {offsets = [8, 0], sizes = [4, 256], strides = [1, 1]} : vector<16x256xf32> to vector<4x256xf32>
    %6 = arith.mulf %4, %1 : vector<4x256xf32>
    %7 = arith.addf %6, %5 : vector<4x256xf32>
    %c0_4 = arith.constant 0 : index
    %c0_5 = arith.constant 0 : index
    %8 = vector.load %arg3[%c0_4, %c0_5] : memref<8x4xf32, #tpu.memory_space<vmem>>, vector<8x4xf32>
    %cst_6 = arith.constant dense<0.000000e+00> : vector<8x256xf32>
    %9 = tpu.matmul %8, %7, %cst_6 {dimension_numbers = #tpu.dot_dimension_numbers<[1], [0], [0], [1], [0, 0, 1, 1], [], []>} : vector<8x4xf32>, vector<4x256xf32>, vector<8x256xf32> -> vector<8x256xf32>
    %cst_7 = arith.constant dense<0.000000e+00> : vector<8xf32>
    %10 = vector.multi_reduction <add>, %9, %cst_7 [1] : vector<8x256xf32> to vector<8xf32>
    %11 = vector.shape_cast %10 : vector<8xf32> to vector<8x1xf32>
    %12 = arith.mulf %9, %9 : vector<8x256xf32>
    %cst_8 = arith.constant dense<0.000000e+00> : vector<8xf32>
    %13 = vector.multi_reduction <add>, %12, %cst_8 [1] : vector<8x256xf32> to vector<8xf32>
    %14 = vector.shape_cast %13 : vector<8xf32> to vector<8x1xf32>
    %cst_9 = arith.constant 3.906250e-03 : f32
    %15 = vector.broadcast %cst_9 : f32 to vector<8x1xf32>
    %16 = arith.mulf %11, %15 : vector<8x1xf32>
    %cst_10 = arith.constant 3.906250e-03 : f32
    %17 = vector.broadcast %cst_10 : f32 to vector<8x1xf32>
    %18 = arith.mulf %14, %17 : vector<8x1xf32>
    %19 = arith.mulf %16, %16 : vector<8x1xf32>
    %20 = arith.subf %18, %19 : vector<8x1xf32>
    %21 = vector.broadcast %16 : vector<8x1xf32> to vector<8x256xf32>
    %22 = arith.subf %9, %21 : vector<8x256xf32>
    %cst_11 = arith.constant 9.99999974E-6 : f32
    %23 = vector.broadcast %cst_11 : f32 to vector<8x1xf32>
    %24 = arith.addf %20, %23 : vector<8x1xf32>
    %25 = math.rsqrt %24 : vector<8x1xf32>
    %26 = vector.broadcast %25 : vector<8x1xf32> to vector<8x256xf32>
    %27 = arith.mulf %22, %26 : vector<8x256xf32>
    %cst_12 = arith.constant 0.000000e+00 : f32
    %28 = vector.broadcast %cst_12 : f32 to vector<8x256xf32>
    %29 = arith.maximumf %27, %28 : vector<8x256xf32>
    %c0_13 = arith.constant 0 : index
    %c0_14 = arith.constant 0 : index
    %c0_15 = arith.constant 0 : index
    %30 = vector.load %arg4[%c0_13, %c0_14, %c0_15] : memref<1x8x256xf32, #tpu.memory_space<vmem>>, vector<1x8x256xf32>
    %31 = vector.shape_cast %30 : vector<1x8x256xf32> to vector<8x256xf32>
    %32 = vector.shape_cast %29 : vector<8x256xf32> to vector<1x8x256xf32>
    tpu.vector_store %arg4[%c0_13, %c0_14, %c0_15], %32 {strides = array<i32>} : memref<1x8x256xf32, #tpu.memory_space<vmem>>, vector<1x8x256xf32>,
    return
  }
  func.func @transform_0(%arg0: i32) -> (i32, i32, i32) {
    %c0_i32 = arith.constant 0 : i32
    %c0_i32_0 = arith.constant 0 : i32
    %c0_i32_1 = arith.constant 0 : i32
    return %arg0, %c0_i32, %c0_i32_0 : i32, i32, i32
  }
  func.func @transform_1(%arg0: i32) -> (i32, i32) {
    %c0_i32 = arith.constant 0 : i32
    %c0_i32_0 = arith.constant 0 : i32
    %c0_i32_1 = arith.constant 0 : i32
    return %c0_i32, %c0_i32_0 : i32, i32
  }
  func.func @transform_2(%arg0: i32) -> (i32, i32) {
    %c0_i32 = arith.constant 0 : i32
    %c0_i32_0 = arith.constant 0 : i32
    %c0_i32_1 = arith.constant 0 : i32
    return %c0_i32, %c0_i32_0 : i32, i32
  }
  func.func @transform_3(%arg0: i32) -> (i32, i32, i32) {
    %c0_i32 = arith.constant 0 : i32
    %c0_i32_0 = arith.constant 0 : i32
    %c0_i32_1 = arith.constant 0 : i32
    return %arg0, %c0_i32, %c0_i32_0 : i32, i32, i32
  }
}

</mosaic_0001>

<bundles_post_ra>
// kernel: tpu_custom_call.1
= control target key start
LH: loop header
LB: loop body
LE: loop exit
PB: predicated region body
PF: predicated region fallthrough
CT: control target
= control target key end

     0   :  { %8 = vsyncpa [#allocation3], 0  ;;  %s711_s0 = inlined_call_operand.vmem [shape: f32[2,4,256], index: 0, kind: input, shape index: {}]   ;;  %s712_s1 = inlined_call_operand.vmem [shape: f32[16,4], index: 1, kind: input, shape index: {}]   ;;  %s713_s2 = inlined_call_operand.vmem [shape: f32[8,4], index: 2, kind: input, shape index: {}]   ;;  %s714_s3 = inlined_call_operand.hbm [shape: f32[2,8,256], index: 3, kind: output, shape index: {}]  }
   0x1   :  { %10 = vsyncpa [#allocation3 + $0x1], 0  ;;  %s595_s12 = smov 0   ;;  %s597_s13 = smov 0  }
   0x2   :  { %s599_s14 = smov 0   ;;  %s601_s15 = smov 0  }
   0x3 LB: > { %s616_s16 = sadd.s32 4294967295, %s571_s15   ;;  %s445_s17 = sadd.s32 4294967294, %s571_s15   ;;  %s571_s15 = sphi %s601_s15, %s720_s15   ;;  %s567_s14 = sphi %s599_s14, %s719_s14   ;;  %s563_s13 = sphi %s597_s13, %s718_s13   ;;  %s559_s12 = sphi %s595_s12, %s717_s12  }
   0x4   : > { %s620_s18 = sadd.s32 1, %s571_s15   ;;  %s91_s19 = sadd.s32 1, %s567_s14 }
   0x5   : > { %s88_s20 = ssub.s32 %s571_s15, %s620_s18  ;;  %p101_p0 = scmp.ne.s32.totalorder %s567_s14, %s563_s13 }
   0x6   : > { %p89_p1 = scmp.eq.s32.totalorder %s88_s20, 0  ;;  %p102_p2 = scmp.eq.s32.totalorder %s616_s16, 1 }
   0x7   : > { %p107_p3 = scmp.ne.s32.totalorder %s563_s13, %s559_s12  ;;  %p108_p4 = scmp.eq.s32.totalorder %s445_s17, 1 }
   0x8   : > { %s631_s21 = scalar_select %p89_p1, %s567_s14, %s91_s19  }
   0x9   : > { %p633_p5 = por %p102_p2, %p101_p0  ;;  %p637_p6 = por %p108_p4, %p107_p3 }
   0xa   : > { %p448_p7 = scmp.ge.s32.totalorder %s571_s15, 1  ;;  %p140_p8 = scmp.lt.s32.totalorder %s571_s15, 3 }
   0xc   : > { %p141_p9 = pnand %p448_p7, %p140_p8 }
   0xd   : > { %p164_p10 = scmp.lt.s32.totalorder (!%p141_p9), %s616_s16, 1  ;;  %v573_v0 = vmov (!%p141_p9), 0.0   ;;  %vm181_vm0 = vcmask (!%p141_p9), 1043456   ;;  %v170_v3 = vld [vmem:[%s712_s1] sm:$0xff] (!%p141_p9)  ;;  %vm174_vm1 = vcmask (!%p141_p9), 31744   ;;  %v171_v4 = vld [vmem:[%s712_s1 + $0x8] sm:$0xff] (!%p141_p9) }
   0xe   : > { %144 = sbr.rel (%p141_p9) target bundleno = 647 (0x287), region = 32  ;;  %250 = vmatprep.mubr.f32.mxu0 (!%p141_p9), %v573_v0  ;;  %342 = vmatprep.mubr.f32.mxu1 (!%p141_p9), %v573_v0  ;;  %v268_v13 = vld [vmem:[%s713_s2] sm:$0xff] (!%p141_p9)  ;;  %s161_s8 = sand.u32 (!%p141_p9), 1, %s563_s13  }
   0xf   : > { %s449_s9 = sshll.u32 (!%p141_p9), %s161_s8, 4  ;;  %s465_s10 = sshll.u32 (!%p141_p9), %s616_s16, 8 }
  0x10   : > { %s163_s11 = scalar_lea.vmem (!%p141_p9), [#allocation2], %s449_s9  ;;  %s574_s26 = smov (!%p141_p9), [#allocation2]  }
  0x11   : > { %s386_s17 = sshll.u32 (!%p141_p9), %s163_s11, 4  ;;  %s513_s27 = sshll.u32 (!%p141_p9), %s574_s26, 4  ;;  %s671_s17 = int_to_ptr.vmem [resolvable:$true] %s386_s17  ;;  %s514_s27 = int_to_ptr.vmem [resolvable:$false] %s513_s27 }
  0x12   : > { %p516_p0 = scmp.lt.s32.totalorder (!%p141_p9), %s671_s17, %s514_s27 }
  0x15   : > { %s165_s24 = scalar_select %p164_p10, %s616_s16, 1 }
  0x16   : > { %s509_s16 = scalar_lea.vmem %s671_s17, 256 }
  0x17   : > { %s464_s25 = sshll.u32 %s165_s24, 3  ;;  %s669_s24 = scalar_lea.hbm %s714_s3, %s465_s10 }
  0x18   : > { %s168_s28 = scalar_lea.vmem %s711_s0, %s464_s25  ;;  %s372_s25 = scalar_lea.sflag [#allocation3], %s161_s8 }
  0x19   : > { %v169_v1 = vld [vmem:[%s168_s28] sm:$0xff]  ;;  %p510_p11 = scmp.ne.s32.totalorder %s671_s17, %s509_s16  ;;  %s515_s28 = scalar_lea.vmem %s514_s27, 512 }
  0x1a   : > { %v173_v2 = vcombine.high %v169_v1, %v169_v1  ;;  %p517_p1 = scmp.lt.s32.totalorder %s515_s28, %s509_s16 }
  0x1b   : > { %p511_p12 = pnand %p510_p11, %p633_p5 }
  0x1c   : > { %452 = vmatprep.subr.msk.mxu0 %vm181_vm0, %v173_v2  ;;  %p518_p2 = por %p517_p1, %p516_p0 }
  0x1d   : > { %453 = vmatpush1.msk.msra.mxu0 %vm181_vm0, %v169_v1  ;;  %p512_p13 = pneg %p511_p12 }
  0x1e   : > { %454 = vmatmul.mubr.msk.f32.vlgmr.msra.gmra.mrb[0].mxu0 %vm174_vm1, %v170_v3 }
  0x1f   : > { %256 = vmatprep.mubr.f32.mxu0 %v573_v0  ;;  %p519_p3 = pnand %p518_p2, %p512_p13 }
  0x22   : > { %455 = vmatmul.mubr.msk.f32.gmra.mrb[2].mxu0 %vm174_vm1, %v171_v4 }
  0xf1   : > { %v252_v5 = vpop.f32.mrb[0].mxu0 }
  0xf2   : > { %v254_v6 = vpop.f32.mrb[1].mxu0  ;;  %v264_v7 = vmul.f32 %v252_v5, %v169_v1 }
  0xf3   : > { %v265_v8 = vmul.f32 %v254_v6, %v173_v2 }
  0xf5   : > { %v258_v9 = vpop.f32.mrb[2].mxu0 }
  0xf6   : > { %v266_v10 = vadd.f32 %v264_v7, %v258_v9  ;;  %v260_v11 = vpop.f32.mrb[3].mxu0 }
  0xf7   : > { %v267_v12 = vadd.f32 %v265_v8, %v260_v11 }
  0xf9   : > { %456 = vmatprep.subr.msk.mxu1 %vm181_vm0, %v267_v12 }
  0xfa   : > { %457 = vmatpush1.msk.msra.mxu1 %vm181_vm0, %v266_v10 }
  0xfb   : > { %458 = vmatmul.mubr.msk.f32.vlgmr.msra.gmra.mrb[0].mxu1 %vm174_vm1, %v268_v13 }
 0x1ce   : > { %v344_v14 = vpop.f32.mrb[0].mxu1 }
 0x1cf   : > { %v346_v15 = vpop.f32.mrb[1].mxu1  ;;  %v352_v16 = vmul.f32 %v344_v14, %v344_v14 }
 0x1d0   : > { %v353_v17 = vmul.f32 %v346_v15, %v346_v15  ;;  %v349_v18 = vadd.f32 %v346_v15, %v344_v14 }
 0x1d2   : > { %350 = vadd.xlane.f32.xlu0 %v349_v18  ;;  %v354_v19 = vadd.f32 %v353_v17, %v352_v16 }
 0x1d6   : > { %355 = vadd.xlane.f32.xlu0 %v354_v19 }
 0x25f   : > { %v351_v20 = vpop.xlane.xlu0 %350 }
 0x260   : > { %v357_v21 = vmul.f32 0.00390625, %v351_v20 }
 0x262   : > { %v359_v23 = vmul.f32 %v357_v21, %v357_v21  ;;  %v361_v27 = vsub.f32 %v344_v14, %v357_v21  ;;  %v362_v28 = vsub.f32 %v346_v15, %v357_v21 }
 0x263   : > { %v356_v22 = vpop.xlane.xlu0 %355 }
 0x264   : > { %v358_v24 = vmul.f32 0.00390625, %v356_v22 }
 0x266   : > { %v360_v25 = vsub.f32 %v358_v24, %v359_v23 }
 0x268   : > { %v363_v26 = vadd.f32 1e-05, %v360_v25 }
 0x26a   : > { %507 = vrsqrt.f32 %v363_v26 }
 0x274   : > { %v508_v29 = vpop.eup %507 }
 0x275   : > { %v365_v30 = vmul.f32 %v508_v29, %v361_v27  ;;  %v366_v31 = vmul.f32 %v508_v29, %v362_v28 }
 0x277   : > { %v367_v32 = vmax.f32 %v365_v30, 0.0  ;;  %v368_v33 = vmax.f32 %v366_v31, 0.0 }
 0x279   : > { %369 = vst [vmem:[%s163_s11] sm:$0xff] %v367_v32  ;;  %370 = vst [vmem:[%s163_s11 + $0x8] sm:$0xff] %v368_v33 }
 0x27a   : > { %522 = shalt.err (!%p519_p3)
}
 0x27b   : > { %s523_s29 = scalar_lea.hbm %s669_s24, 256  ;;  %s527_s5 = scalar_lea.hbm %s714_s3, 512 }
 0x27c   : > { %p524_p4 = scmp.ne.s32.totalorder %s669_s24, %s523_s29  ;;  %p528_p9 = scmp.lt.u32.totalorder %s669_s24, %s714_s3 }
 0x27d   : > { %p529_p10 = scmp.lt.u32.totalorder %s527_s5, %s523_s29  ;;  %p531_p12 = scmp.lt.u32.totalorder %s523_s29, %s669_s24 }
 0x27e   : > { %p525_p7 = pnand %p524_p4, %p633_p5 }
 0x27f   : > { %p530_p11 = por %p529_p10, %p528_p9 }
 0x280   : > { %p526_p8 = pneg %p525_p7 }
 0x281   : > { %p532_p13 = por %p531_p12, %p530_p11 }
 0x283   : > { %p533_p0 = pnand %p532_p13, %p526_p8 }
 0x285   : > { %536 = shalt.err (!%p533_p0)
}
 0x286   : > { %466 = dma.vmem_to_hbm [thread:$0]  (%p633_p5), %s671_s17, 256, %s669_s24, %s372_s25  }
 0x287 PF: > { %p472_p1 = scmp.ge.s32.totalorder %s571_s15, 2  ;;  %s398_s8 = sand.u32 1, %s559_s12  }
 0x288   : > { %s399_s9 = scalar_lea.sflag [#allocation3], %s398_s8 }
 0x289   : > { %p469_p2 = pnand %p472_p1, %p637_p6 }
 0x28b   : > { %554 = dma.done.wait (!%p469_p2), %s399_s9, 256  }
 0x28c   : > { %556 = vsyncadd (!%p469_p2), %s399_s9, 4294967040  ;;  %p13_p3 = scmp.ge.s32.totalorder %s620_s18, 4   ;;  %s717_s12 = smov %s563_s13 }
 0x28d   : > { %s718_s13 = smov %s567_s14  ;;  %s719_s14 = smov %s631_s21 }
 0x28e   : > { %s720_s15 = smov %s620_s18  ;;  %15 = sbr.rel (!%p13_p3) target bundleno = 3 (0x3), region = 67 }
 0x295   :  { %404 = vsyncpa [#allocation3], 1 }
 0x296   :  { %406 = vsyncpa [#allocation3 + $0x1], 1 }

</bundles_post_ra>
